<compile_context>
chip_gen: v7x
topology: tpu7x:2x2x1
jax: 0.10.0
libtpu: 0.0.40
codegen_flags: <defaults>
</compile_context>

<pallas_src>
import functools

import jax
import jax.numpy as jnp
import numpy as np
from jax.experimental import pallas as pl
from jax.experimental.pallas import tpu as pltpu


def _acc_width(tn):
    """Lane width of the per-step partial-sum accumulators."""
    return 128 if (tn >= 128 and tn % 128 == 0) else tn


def _fold_lanes(x, width):
    """Fold the last dim of `x` down to `width` with lane-aligned VPU adds.

    Slices are 128-lane aligned so they are plain vreg selections; the adds
    ride in spare VALU slots.  The expensive cross-lane reduction is deferred
    to the finalize branch.
    """
    tn = x.shape[-1]
    if tn == width:
        return x
    k = tn // width
    out = x[..., :width]
    for i in range(1, k):
        out = out + x[..., i * width:(i + 1) * width]
    return out


def _cre_loss_neg_kernel(cls_ref, patch_ref, mask_ref, lbl_ref, out_ref,
                         xs_sc, rowsum_sc, flagcnt_sc, flagdot_sc, *, temp):
    n = pl.program_id(1)

    @pl.when(n == 0)
    def _():
        rowsum_sc[...] = jnp.zeros_like(rowsum_sc)
        flagcnt_sc[...] = jnp.zeros_like(flagcnt_sc)
        flagdot_sc[...] = jnp.zeros_like(flagdot_sc)
        # F.normalize(p=2, dim=2, eps=1e-8): x / max(||x||, 1e-8); fold 1/temp.
        # Hoisted: runs once per batch tile, reused for every N tile.
        x = cls_ref[...].astype(jnp.float32)                       # (TB, C, D)
        sumsq = jnp.sum(x * x, axis=-1, keepdims=True)             # (TB, C, 1)
        inv = jax.lax.rsqrt(jnp.maximum(sumsq, 1e-16)) * (1.0 / temp)
        xs_sc[...] = (x * inv).astype(jnp.bfloat16)                # bf16 cache

    # Patch block streamed at its HBM dtype; cast to bf16 in VMEM only, so the
    # MXU sees a native bf16 x bf16 matmul without an extra HBM pass.
    p = patch_ref[...]
    if p.dtype != jnp.bfloat16:
        p = p.astype(jnp.bfloat16)

    # s = (normalized cls / temp) @ patch  -> scaled raw logits, f32 accumulate.
    s = jnp.einsum("bcd,bdn->bcn", xs_sc[...], p,
                   preferred_element_type=jnp.float32)             # (TB, C, TN)

    tb, c, tn = s.shape
    width = rowsum_sc.shape[-1]

    # (1, C, 1) class-index iota; broadcasts against the (TB, 1, TN) mask.
    cls_idx = jax.lax.broadcasted_iota(jnp.int32, (1, c, 1), 1) + 1
    is_flag = mask_ref[...].astype(jnp.int32) == cls_idx           # (TB, C, TN)

    # Lane-dense partial accumulation (pure VPU adds every step).
    rowsum_sc[...] += _fold_lanes(jnp.exp(s), width)
    flagcnt_sc[...] += _fold_lanes(is_flag.astype(jnp.float32), width)
    flagdot_sc[...] += _fold_lanes(jnp.where(is_flag, s, 0.0), width)

    @pl.when(n == pl.num_programs(1) - 1)
    def _():
        rowsum = jnp.sum(rowsum_sc[...], axis=-1, keepdims=True)   # (TB, C, 1)
        cnt = jnp.sum(flagcnt_sc[...], axis=-1, keepdims=True)     # (TB, C, 1)
        dot = jnp.sum(flagdot_sc[...], axis=-1, keepdims=True)     # (TB, C, 1)
        # sum_{flagged} -log(exp(s)/(rowsum+1e-4)) = cnt*log(rowsum+1e-4) - dot
        # else branch (rowsum == 0): loss is the scalar log(1 + rowsum + 1e-4).
        num = jnp.where(rowsum != 0.0,
                        cnt * jnp.log(rowsum + 1e-4) - dot,
                        cnt * jnp.log(1.0 + rowsum + 1e-4))
        per_cls = jnp.where(lbl_ref[...] == 1, num / (cnt + 1e-4), 0.0)
        out_ref[...] = jnp.sum(per_cls, axis=1)[None, :, :]        # (1, TB, 1)


def _tpu_vmem_bytes():
    """Per-TensorCore VMEM capacity; conservative (v7x-like) fallback."""
    try:
        info = pltpu.get_tpu_info()
        for name in ("vmem_capacity_bytes", "vmem_size_bytes", "vmem_bytes"):
            v = getattr(info, name, None)
            if v:
                return int(v)
    except Exception:
        pass
    return 64 * 1024 * 1024


def _choose_tiles(b, c, d, n, *, patch_bytes, mask_bytes, vmem_bytes):
    """Generation-aware (TB, TN, vmem_limit) selection.

    v5e/v6e (128 MiB VMEM, 1 TensorCore): large working-set budget, tb up to B
    (a 'parallel' batch axis is just a serial loop there, fewer steps = less
    fixed per-step overhead), prefer tn = N for contiguous patch DMAs.
    v7x (64 MiB VMEM, 2 TensorCores): tighter budget and keep >= 2 batch tiles
    so megacore can shard the 'parallel' batch axis.
    """
    if vmem_bytes >= 100 * 1024 * 1024:          # v5e / v6e
        budget = 56 * 1024 * 1024
        vmem_limit = 96 * 1024 * 1024
        min_btiles = 1
    else:                                        # v7x (or unknown -> safe)
        budget = 24 * 1024 * 1024
        vmem_limit = 48 * 1024 * 1024
        min_btiles = 2 if b >= 2 else 1

    cpad = -(-c // 8) * 8

    def fits(tb_, tn_):
        aw = _acc_width(tn_)
        patch = 2 * tb_ * d * tn_ * patch_bytes          # double-buffered
        mask = 2 * tb_ * tn_ * mask_bytes
        cls = 2 * tb_ * cpad * d * 4
        lbl = 2 * tb_ * cpad * 4
        scratch = 3 * tb_ * cpad * aw * 4 + tb_ * cpad * d * 2
        temps = tb_ * d * tn_ * 2 + 4 * tb_ * cpad * tn_ * 4   # bf16 patch + s/exp/flag
        return patch + mask + cls + lbl + scratch + temps <= budget

    # TN: prefer the full row (fully contiguous patch DMA); otherwise the
    # largest multiple-of-128 divisor, floored at 512 where possible.
    multiples = [t for t in range(128, n, 128) if n % t == 0]
    cands = ([n]
             + sorted([t for t in multiples if t >= 512], reverse=True)
             + sorted([t for t in multiples if t < 512], reverse=True))
    tn = cands[-1]
    for t in cands:
        if fits(1, t):
            tn = t
            break

    # TB: largest divisor of b that fits and keeps >= min_btiles batch tiles.
    tb = 1
    for t in range(1, b + 1):
        if b % t == 0 and b // t >= min_btiles and fits(t, tn):
            tb = t
    return tb, tn, vmem_limit


def cre_loss_neg(cls_tokens_visual, patch_tokens, masks, cls_labels, temp=1.0,
                 *, tb=None, tn=None):
    """Pallas forward of CRELoss_neg.

    patch_tokens and masks are streamed at their incoming dtypes (pass bf16
    patch tokens / uint8 masks from the producer to minimize HBM traffic);
    any needed casts happen inside the kernel.
    """
    b, C, D = cls_tokens_visual.shape
    patch_flat = patch_tokens.reshape(b, D, -1)          # source dtype, no cast
    N = patch_flat.shape[-1]
    mask_flat = masks.reshape(b, 1, N)                   # source dtype (uint8 ok)
    labels = cls_labels.reshape(b, C, 1).astype(jnp.int32)
    cls_tok = cls_tokens_visual.astype(jnp.float32)      # tiny; keep f32

    vmem_bytes = _tpu_vmem_bytes()
    tb_auto, tn_auto, vmem_limit = _choose_tiles(
        b, C, D, N,
        patch_bytes=patch_flat.dtype.itemsize,
        mask_bytes=mask_flat.dtype.itemsize,
        vmem_bytes=vmem_bytes)
    tb = tb_auto if tb is None else tb
    tn = tn_auto if tn is None else tn
    assert b % tb == 0 and N % tn == 0, (b, tb, N, tn)

    acc_w = _acc_width(tn)
    kernel = functools.partial(_cre_loss_neg_kernel, temp=float(temp))
    n_btiles = b // tb
    n_ntiles = N // tn

    out = pl.pallas_call(
        kernel,
        out_shape=jax.ShapeDtypeStruct((n_btiles, tb, 1), jnp.float32),
        grid_spec=pltpu.PrefetchScalarGridSpec(
            num_scalar_prefetch=0,
            grid=(n_btiles, n_ntiles),
            in_specs=[
                pl.BlockSpec((tb, C, D), lambda i, n: (i, 0, 0)),   # cls (f32)
                pl.BlockSpec((tb, D, tn), lambda i, n: (i, 0, n)),  # patch
                pl.BlockSpec((tb, 1, tn), lambda i, n: (i, 0, n)),  # mask
                pl.BlockSpec((tb, C, 1), lambda i, n: (i, 0, 0)),   # labels
            ],
            out_specs=pl.BlockSpec((1, tb, 1), lambda i, n: (i, 0, 0)),
            # TODO(synk): sweep pipeline_mode=pl.Buffered(3) on the patch spec
            # once tile sizes are final (v5e/v6e only; tighter VMEM on v7x).
            scratch_shapes=[
                pltpu.VMEM((tb, C, D), jnp.bfloat16),     # normalized cls/temp
                pltpu.VMEM((tb, C, acc_w), jnp.float32),  # sum exp(s) partials
                pltpu.VMEM((tb, C, acc_w), jnp.float32),  # flag count partials
                pltpu.VMEM((tb, C, acc_w), jnp.float32),  # sum flag*s partials
            ],
        ),
        compiler_params=pltpu.CompilerParams(
            dimension_semantics=("parallel", "arbitrary"),
            vmem_limit_bytes=vmem_limit,
        ),
    )(cls_tok, patch_flat, mask_flat, labels)

    # Per-batch partial losses -> mean over batch (done here so the batch grid
    # axis can be 'parallel' / megacore-sharded).
    return jnp.sum(out) / b


def cre_loss_neg_ref(cls_tokens_visual, patch_tokens, masks, cls_labels,
                     temp=1.0):
    """Pure-JAX f32 reference mirroring the PyTorch forward, for verification."""
    b, C, D = cls_tokens_visual.shape
    x = cls_tokens_visual / jnp.maximum(
        jnp.linalg.norm(cls_tokens_visual, axis=2, keepdims=True), 1e-8)
    p = patch_tokens.reshape(b, D, -1).astype(jnp.float32)
    logits = jnp.exp(jnp.einsum("bcd,bdn->bcn", x, p) / temp)      # (b,C,N)
    s = jnp.sum(logits, axis=-1, keepdims=True)                    # (b,C,1)
    loss = jnp.where(s != 0.0,
                     -jnp.log(logits / (s + 1e-4)),
                     jnp.log(1.0 + s + 1e-4))                      # (b,C,N)
    m = masks.reshape(b, 1, -1).astype(jnp.int32)
    cls_idx = jnp.arange(1, C + 1, dtype=jnp.int32).reshape(1, C, 1)
    flag = (m == cls_idx).astype(jnp.float32)                      # (b,C,N)
    per_cls = jnp.sum(flag * loss, axis=-1) / (jnp.sum(flag, axis=-1) + 1e-4)
    per_cls = jnp.where(cls_labels == 1, per_cls, 0.0)
    return jnp.sum(per_cls) / b


def _make_inputs(key, B, C, D, H, W, mask_dtype=jnp.uint8):
    k1, k2, k3, k4, k5 = jax.random.split(key, 5)
    cls_tokens_visual = jax.random.normal(k1, (B, C, D), dtype=jnp.float32)
    patch_tokens = jax.random.normal(k2, (B, D, H, W), dtype=jnp.float32)
    # mask values in {0, 1..C} plus a few 255 ("unknown") pixels
    masks = jax.random.randint(k3, (B, H, W), 0, C + 1, dtype=jnp.int32)
    unk = jax.random.bernoulli(k4, 0.05, (B, H, W))
    masks = jnp.where(unk, jnp.int32(255), masks).astype(mask_dtype)
    cls_labels = jax.random.randint(k5, (B, C), 0, 2, dtype=jnp.int32)
    cls_labels = cls_labels.at[:, 0].set(1)   # at least one positive class
    return cls_tokens_visual, patch_tokens, masks, cls_labels


if __name__ == "__main__":
    key = jax.random.PRNGKey(0)
    k_a, k_b = jax.random.split(key)

    # Test 1: the module's natural small shapes; uint8 masks (byte streaming).
    B, C, D, H, W = 2, 4, 32, 16, 16
    cls_t, patch_t, masks_t, lbl_t = _make_inputs(k_a, B, C, D, H, W,
                                                  mask_dtype=jnp.uint8)
    out = cre_loss_neg(cls_t, patch_t, masks_t, lbl_t, temp=1.0)
    out = jax.block_until_ready(out)
    ref = cre_loss_neg_ref(cls_t, patch_t, masks_t, lbl_t, temp=1.0)
    np.testing.assert_allclose(np.asarray(out), np.asarray(ref),
                               rtol=1e-2, atol=1e-2)

    # Test 2: larger shapes forcing multi batch-tile / multi N-tile paths,
    # with int32 masks (dtype-agnostic streaming path).
    B2, C2, D2, H2, W2 = 16, 4, 32, 32, 32
    cls2, patch2, masks2, lbl2 = _make_inputs(k_b, B2, C2, D2, H2, W2,
                                              mask_dtype=jnp.int32)
    out2 = cre_loss_neg(cls2, patch2, masks2, lbl2, temp=0.5, tb=8, tn=256)
    out2 = jax.block_until_ready(out2)
    ref2 = cre_loss_neg_ref(cls2, patch2, masks2, lbl2, temp=0.5)
    np.testing.assert_allclose(np.asarray(out2), np.asarray(ref2),
                               rtol=1e-2, atol=1e-2)

    print("KERNEL_OK")
</pallas_src>

<mosaic_0001>
module attributes {stable_mosaic.version = 11 : i64} {
  func.func @_cre_loss_neg_kernel(%arg0: i32, %arg1: i32, %arg2: memref<1x4x32xf32, #tpu.memory_space<vmem>>, %arg3: memref<1x32x256xf32, #tpu.memory_space<vmem>>, %arg4: memref<1x1x256xi8, #tpu.memory_space<vmem>>, %arg5: memref<1x4x1xi32, #tpu.memory_space<vmem>>, %arg6: memref<1x1x1xf32, #tpu.memory_space<vmem>>, %arg7: memref<1x4x32xbf16, #tpu.memory_space<vmem>>, %arg8: memref<1x4x128xf32, #tpu.memory_space<vmem>>, %arg9: memref<1x4x128xf32, #tpu.memory_space<vmem>>, %arg10: memref<1x4x128xf32, #tpu.memory_space<vmem>>) attributes {dimension_semantics = [#tpu.dimension_semantics<parallel>, #tpu.dimension_semantics<arbitrary>], iteration_bounds = array<i64: 2, 1>, scalar_prefetch = 0 : i64, scratch_operands = 4 : i64, tpu.core_type = #tpu.core_type<tc>, window_params = [{transform_indices = @transform_0, window_bounds = array<i64: 1, 4, 32>}, {transform_indices = @transform_1, window_bounds = array<i64: 1, 32, 256>}, {transform_indices = @transform_2, window_bounds = array<i64: 1, 1, 256>}, {transform_indices = @transform_3, window_bounds = array<i64: 1, 4, 1>}, {transform_indices = @transform_4, window_bounds = array<i64: 1, 1, 1>}]} {
    %c0_i32 = arith.constant 0 : i32
    %0 = arith.cmpi eq, %arg1, %c0_i32 : i32
    %1 = arith.extui %0 : i1 to i32
    %c0_i32_0 = arith.constant 0 : i32
    %2 = arith.cmpi ne, %1, %c0_i32_0 : i32
    scf.if %2 {
      %cst_30 = arith.constant 0.000000e+00 : f32
      %41 = vector.broadcast %cst_30 : f32 to vector<1x4x128xf32>
      %c0_31 = arith.constant 0 : index
      %c0_32 = arith.constant 0 : index
      %c0_33 = arith.constant 0 : index
      %42 = vector.load %arg8[%c0_31, %c0_32, %c0_33] : memref<1x4x128xf32, #tpu.memory_space<vmem>>, vector<1x4x128xf32>
      tpu.vector_store %arg8[%c0_31, %c0_32, %c0_33], %41 {strides = array<i32>} : memref<1x4x128xf32, #tpu.memory_space<vmem>>, vector<1x4x128xf32>,
      %cst_34 = arith.constant 0.000000e+00 : f32
      %43 = vector.broadcast %cst_34 : f32 to vector<1x4x128xf32>
      %c0_35 = arith.constant 0 : index
      %c0_36 = arith.constant 0 : index
      %c0_37 = arith.constant 0 : index
      %44 = vector.load %arg9[%c0_35, %c0_36, %c0_37] : memref<1x4x128xf32, #tpu.memory_space<vmem>>, vector<1x4x128xf32>
      tpu.vector_store %arg9[%c0_35, %c0_36, %c0_37], %43 {strides = array<i32>} : memref<1x4x128xf32, #tpu.memory_space<vmem>>, vector<1x4x128xf32>,
      %cst_38 = arith.constant 0.000000e+00 : f32
      %45 = vector.broadcast %cst_38 : f32 to vector<1x4x128xf32>
      %c0_39 = arith.constant 0 : index
      %c0_40 = arith.constant 0 : index
      %c0_41 = arith.constant 0 : index
      %46 = vector.load %arg10[%c0_39, %c0_40, %c0_41] : memref<1x4x128xf32, #tpu.memory_space<vmem>>, vector<1x4x128xf32>
      tpu.vector_store %arg10[%c0_39, %c0_40, %c0_41], %45 {strides = array<i32>} : memref<1x4x128xf32, #tpu.memory_space<vmem>>, vector<1x4x128xf32>,
      %c0_42 = arith.constant 0 : index
      %c0_43 = arith.constant 0 : index
      %c0_44 = arith.constant 0 : index
      %47 = vector.load %arg2[%c0_42, %c0_43, %c0_44] : memref<1x4x32xf32, #tpu.memory_space<vmem>>, vector<1x4x32xf32>
      %48 = arith.mulf %47, %47 : vector<1x4x32xf32>
      %cst_45 = arith.constant dense<0.000000e+00> : vector<1x4xf32>
      %49 = vector.multi_reduction <add>, %48, %cst_45 [2] : vector<1x4x32xf32> to vector<1x4xf32>
      %50 = vector.shape_cast %49 : vector<1x4xf32> to vector<1x4x1xf32>
      %cst_46 = arith.constant 1.000000e-16 : f32
      %51 = vector.broadcast %cst_46 : f32 to vector<1x4x1xf32>
      %52 = arith.maximumf %50, %51 : vector<1x4x1xf32>
      %53 = math.rsqrt %52 : vector<1x4x1xf32>
      %cst_47 = arith.constant 1.000000e+00 : f32
      %54 = vector.broadcast %cst_47 : f32 to vector<1x4x1xf32>
      %55 = arith.mulf %53, %54 : vector<1x4x1xf32>
      %56 = vector.broadcast %55 : vector<1x4x1xf32> to vector<1x4x32xf32>
      %57 = arith.mulf %47, %56 : vector<1x4x32xf32>
      %58 = arith.truncf %57 : vector<1x4x32xf32> to vector<1x4x32xbf16>
      %c0_48 = arith.constant 0 : index
      %c0_49 = arith.constant 0 : index
      %c0_50 = arith.constant 0 : index
      %59 = vector.load %arg7[%c0_48, %c0_49, %c0_50] : memref<1x4x32xbf16, #tpu.memory_space<vmem>>, vector<1x4x32xbf16>
      tpu.vector_store %arg7[%c0_48, %c0_49, %c0_50], %58 {strides = array<i32>} : memref<1x4x32xbf16, #tpu.memory_space<vmem>>, vector<1x4x32xbf16>,
    } else {
    }
    %c0 = arith.constant 0 : index
    %c0_1 = arith.constant 0 : index
    %c0_2 = arith.constant 0 : index
    %3 = vector.load %arg3[%c0, %c0_1, %c0_2] : memref<1x32x256xf32, #tpu.memory_space<vmem>>, vector<1x32x256xf32>
    %4 = arith.truncf %3 : vector<1x32x256xf32> to vector<1x32x256xbf16>
    %c0_3 = arith.constant 0 : index
    %c0_4 = arith.constant 0 : index
    %c0_5 = arith.constant 0 : index
    %5 = vector.load %arg7[%c0_3, %c0_4, %c0_5] : memref<1x4x32xbf16, #tpu.memory_space<vmem>>, vector<1x4x32xbf16>
    "tpu.trace_start"() <{level = 10 : i32, message = "bcd,bdn->bcn"}> : () -> ()
    %cst = arith.constant dense<0.000000e+00> : vector<1x4x256xf32>
    %6 = tpu.matmul %5, %4, %cst {dimension_numbers = #tpu.dot_dimension_numbers<[2], [1], [1], [2], [0, 0, 0, 1, 1, 2], [0], [0]>} : vector<1x4x32xbf16>, vector<1x32x256xbf16>, vector<1x4x256xf32> -> vector<1x4x256xf32>
    "tpu.trace_stop"() : () -> ()
    %7 = tpu.iota {dimensions = array<i32: 1>} : vector<1x4x1xi32>
    %c1_i32 = arith.constant 1 : i32
    %8 = vector.broadcast %c1_i32 : i32 to vector<1x4x1xi32>
    %9 = arith.addi %7, %8 : vector<1x4x1xi32>
    %c0_6 = arith.constant 0 : index
    %c0_7 = arith.constant 0 : index
    %c0_8 = arith.constant 0 : index
    %10 = vector.load %arg4[%c0_6, %c0_7, %c0_8] : memref<1x1x256xi8, #tpu.memory_space<vmem>>, vector<1x1x256xi8>
    %11 = arith.extui %10 : vector<1x1x256xi8> to vector<1x1x256xi32>
    %12 = vector.broadcast %11 : vector<1x1x256xi32> to vector<1x4x256xi32>
    %13 = vector.broadcast %9 : vector<1x4x1xi32> to vector<1x4x256xi32>
    %14 = arith.cmpi eq, %12, %13 : vector<1x4x256xi32>
    %c0_9 = arith.constant 0 : index
    %c0_10 = arith.constant 0 : index
    %c0_11 = arith.constant 0 : index
    %15 = vector.load %arg8[%c0_9, %c0_10, %c0_11] : memref<1x4x128xf32, #tpu.memory_space<vmem>>, vector<1x4x128xf32>
    %16 = math.exp %6 : vector<1x4x256xf32>
    %17 = vector.extract_strided_slice %16 {offsets = [0, 0, 0], sizes = [1, 4, 128], strides = [1, 1, 1]} : vector<1x4x256xf32> to vector<1x4x128xf32>
    %18 = vector.extract_strided_slice %16 {offsets = [0, 0, 128], sizes = [1, 4, 128], strides = [1, 1, 1]} : vector<1x4x256xf32> to vector<1x4x128xf32>
    %19 = arith.addf %17, %18 : vector<1x4x128xf32>
    %20 = arith.addf %15, %19 : vector<1x4x128xf32>
    %c0_12 = arith.constant 0 : index
    %c0_13 = arith.constant 0 : index
    %c0_14 = arith.constant 0 : index
    %21 = vector.load %arg8[%c0_12, %c0_13, %c0_14] : memref<1x4x128xf32, #tpu.memory_space<vmem>>, vector<1x4x128xf32>
    tpu.vector_store %arg8[%c0_12, %c0_13, %c0_14], %20 {strides = array<i32>} : memref<1x4x128xf32, #tpu.memory_space<vmem>>, vector<1x4x128xf32>,
    %c0_15 = arith.constant 0 : index
    %c0_16 = arith.constant 0 : index
    %c0_17 = arith.constant 0 : index
    %22 = vector.load %arg9[%c0_15, %c0_16, %c0_17] : memref<1x4x128xf32, #tpu.memory_space<vmem>>, vector<1x4x128xf32>
    %23 = arith.extui %14 : vector<1x4x256xi1> to vector<1x4x256xi32>
    %24 = arith.sitofp %23 : vector<1x4x256xi32> to vector<1x4x256xf32>
    %25 = vector.extract_strided_slice %24 {offsets = [0, 0, 0], sizes = [1, 4, 128], strides = [1, 1, 1]} : vector<1x4x256xf32> to vector<1x4x128xf32>
    %26 = vector.extract_strided_slice %24 {offsets = [0, 0, 128], sizes = [1, 4, 128], strides = [1, 1, 1]} : vector<1x4x256xf32> to vector<1x4x128xf32>
    %27 = arith.addf %25, %26 : vector<1x4x128xf32>
    %28 = arith.addf %22, %27 : vector<1x4x128xf32>
    %c0_18 = arith.constant 0 : index
    %c0_19 = arith.constant 0 : index
    %c0_20 = arith.constant 0 : index
    %29 = vector.load %arg9[%c0_18, %c0_19, %c0_20] : memref<1x4x128xf32, #tpu.memory_space<vmem>>, vector<1x4x128xf32>
    tpu.vector_store %arg9[%c0_18, %c0_19, %c0_20], %28 {strides = array<i32>} : memref<1x4x128xf32, #tpu.memory_space<vmem>>, vector<1x4x128xf32>,
    %c0_21 = arith.constant 0 : index
    %c0_22 = arith.constant 0 : index
    %c0_23 = arith.constant 0 : index
    %30 = vector.load %arg10[%c0_21, %c0_22, %c0_23] : memref<1x4x128xf32, #tpu.memory_space<vmem>>, vector<1x4x128xf32>
    %cst_24 = arith.constant 0.000000e+00 : f32
    %31 = vector.broadcast %cst_24 : f32 to vector<1x4x256xf32>
    %32 = arith.select %14, %6, %31 : vector<1x4x256xi1>, vector<1x4x256xf32>
    %33 = vector.extract_strided_slice %32 {offsets = [0, 0, 0], sizes = [1, 4, 128], strides = [1, 1, 1]} : vector<1x4x256xf32> to vector<1x4x128xf32>
    %34 = vector.extract_strided_slice %32 {offsets = [0, 0, 128], sizes = [1, 4, 128], strides = [1, 1, 1]} : vector<1x4x256xf32> to vector<1x4x128xf32>
    %35 = arith.addf %33, %34 : vector<1x4x128xf32>
    %36 = arith.addf %30, %35 : vector<1x4x128xf32>
    %c0_25 = arith.constant 0 : index
    %c0_26 = arith.constant 0 : index
    %c0_27 = arith.constant 0 : index
    %37 = vector.load %arg10[%c0_25, %c0_26, %c0_27] : memref<1x4x128xf32, #tpu.memory_space<vmem>>, vector<1x4x128xf32>
    tpu.vector_store %arg10[%c0_25, %c0_26, %c0_27], %36 {strides = array<i32>} : memref<1x4x128xf32, #tpu.memory_space<vmem>>, vector<1x4x128xf32>,
    %c0_i32_28 = arith.constant 0 : i32
    %38 = arith.cmpi eq, %arg1, %c0_i32_28 : i32
    %39 = arith.extui %38 : i1 to i32
    %c0_i32_29 = arith.constant 0 : i32
    %40 = arith.cmpi ne, %39, %c0_i32_29 : i32
    scf.if %40 {
      %c0_30 = arith.constant 0 : index
      %c0_31 = arith.constant 0 : index
      %c0_32 = arith.constant 0 : index
      %41 = vector.load %arg8[%c0_30, %c0_31, %c0_32] : memref<1x4x128xf32, #tpu.memory_space<vmem>>, vector<1x4x128xf32>
      %cst_33 = arith.constant dense<0.000000e+00> : vector<1x4xf32>
      %42 = vector.multi_reduction <add>, %41, %cst_33 [2] : vector<1x4x128xf32> to vector<1x4xf32>
      %43 = vector.shape_cast %42 : vector<1x4xf32> to vector<1x4x1xf32>
      %c0_34 = arith.constant 0 : index
      %c0_35 = arith.constant 0 : index
      %c0_36 = arith.constant 0 : index
      %44 = vector.load %arg9[%c0_34, %c0_35, %c0_36] : memref<1x4x128xf32, #tpu.memory_space<vmem>>, vector<1x4x128xf32>
      %cst_37 = arith.constant dense<0.000000e+00> : vector<1x4xf32>
      %45 = vector.multi_reduction <add>, %44, %cst_37 [2] : vector<1x4x128xf32> to vector<1x4xf32>
      %46 = vector.shape_cast %45 : vector<1x4xf32> to vector<1x4x1xf32>
      %c0_38 = arith.constant 0 : index
      %c0_39 = arith.constant 0 : index
      %c0_40 = arith.constant 0 : index
      %47 = vector.load %arg10[%c0_38, %c0_39, %c0_40] : memref<1x4x128xf32, #tpu.memory_space<vmem>>, vector<1x4x128xf32>
      %cst_41 = arith.constant dense<0.000000e+00> : vector<1x4xf32>
      %48 = vector.multi_reduction <add>, %47, %cst_41 [2] : vector<1x4x128xf32> to vector<1x4xf32>
      %49 = vector.shape_cast %48 : vector<1x4xf32> to vector<1x4x1xf32>
      %cst_42 = arith.constant 0.000000e+00 : f32
      %50 = vector.broadcast %cst_42 : f32 to vector<1x4x1xf32>
      %51 = arith.cmpf one, %43, %50 : vector<1x4x1xf32>
      %cst_43 = arith.constant 9.99999974E-5 : f32
      %52 = vector.broadcast %cst_43 : f32 to vector<1x4x1xf32>
      %53 = arith.addf %43, %52 : vector<1x4x1xf32>
      %54 = math.log %53 : vector<1x4x1xf32>
      %55 = arith.mulf %46, %54 : vector<1x4x1xf32>
      %56 = arith.subf %55, %49 : vector<1x4x1xf32>
      %cst_44 = arith.constant 1.000000e+00 : f32
      %57 = vector.broadcast %cst_44 : f32 to vector<1x4x1xf32>
      %58 = arith.addf %57, %43 : vector<1x4x1xf32>
      %cst_45 = arith.constant 9.99999974E-5 : f32
      %59 = vector.broadcast %cst_45 : f32 to vector<1x4x1xf32>
      %60 = arith.addf %58, %59 : vector<1x4x1xf32>
      %61 = math.log %60 : vector<1x4x1xf32>
      %62 = arith.mulf %46, %61 : vector<1x4x1xf32>
      %63 = arith.select %51, %56, %62 : vector<1x4x1xi1>, vector<1x4x1xf32>
      %c0_46 = arith.constant 0 : index
      %c0_47 = arith.constant 0 : index
      %c0_48 = arith.constant 0 : index
      %64 = vector.load %arg5[%c0_46, %c0_47, %c0_48] : memref<1x4x1xi32, #tpu.memory_space<vmem>>, vector<1x4x1xi32>
      %c1_i32_49 = arith.constant 1 : i32
      %65 = vector.broadcast %c1_i32_49 : i32 to vector<1x4x1xi32>
      %66 = arith.cmpi eq, %64, %65 : vector<1x4x1xi32>
      %cst_50 = arith.constant 9.99999974E-5 : f32
      %67 = vector.broadcast %cst_50 : f32 to vector<1x4x1xf32>
      %68 = arith.addf %46, %67 : vector<1x4x1xf32>
      %69 = arith.divf %63, %68 : vector<1x4x1xf32>
      %cst_51 = arith.constant 0.000000e+00 : f32
      %70 = vector.broadcast %cst_51 : f32 to vector<1x4x1xf32>
      %71 = arith.select %66, %69, %70 : vector<1x4x1xi1>, vector<1x4x1xf32>
      %cst_52 = arith.constant dense<0.000000e+00> : vector<1x1xf32>
      %72 = vector.multi_reduction <add>, %71, %cst_52 [1] : vector<1x4x1xf32> to vector<1x1xf32>
      %73 = vector.shape_cast %72 : vector<1x1xf32> to vector<1x1x1xf32>
      %c0_53 = arith.constant 0 : index
      %c0_54 = arith.constant 0 : index
      %c0_55 = arith.constant 0 : index
      %74 = vector.load %arg6[%c0_53, %c0_54, %c0_55] : memref<1x1x1xf32, #tpu.memory_space<vmem>>, vector<1x1x1xf32>
      tpu.vector_store %arg6[%c0_53, %c0_54, %c0_55], %73 {strides = array<i32>} : memref<1x1x1xf32, #tpu.memory_space<vmem>>, vector<1x1x1xf32>,
    } else {
    }
    return
  }
  func.func @transform_0(%arg0: i32, %arg1: i32) -> (i32, i32, i32) {
    %c0_i32 = arith.constant 0 : i32
    %c0_i32_0 = arith.constant 0 : i32
    %c0_i32_1 = arith.constant 0 : i32
    return %arg0, %c0_i32, %c0_i32_0 : i32, i32, i32
  }
  func.func @transform_1(%arg0: i32, %arg1: i32) -> (i32, i32, i32) {
    %c0_i32 = arith.constant 0 : i32
    %c0_i32_0 = arith.constant 0 : i32
    return %arg0, %c0_i32, %arg1 : i32, i32, i32
  }
  func.func @transform_2(%arg0: i32, %arg1: i32) -> (i32, i32, i32) {
    %c0_i32 = arith.constant 0 : i32
    %c0_i32_0 = arith.constant 0 : i32
    return %arg0, %c0_i32, %arg1 : i32, i32, i32
  }
  func.func @transform_3(%arg0: i32, %arg1: i32) -> (i32, i32, i32) {
    %c0_i32 = arith.constant 0 : i32
    %c0_i32_0 = arith.constant 0 : i32
    %c0_i32_1 = arith.constant 0 : i32
    return %arg0, %c0_i32, %c0_i32_0 : i32, i32, i32
  }
  func.func @transform_4(%arg0: i32, %arg1: i32) -> (i32, i32, i32) {
    %c0_i32 = arith.constant 0 : i32
    %c0_i32_0 = arith.constant 0 : i32
    %c0_i32_1 = arith.constant 0 : i32
    return %arg0, %c0_i32, %c0_i32_0 : i32, i32, i32
  }
}

</mosaic_0001>

<bundles_post_ra>
// kernel: tpu_custom_call.1
= control target key start
LH: loop header
LB: loop body
LE: loop exit
PB: predicated region body
PF: predicated region fallthrough
CT: control target
= control target key end

     0   :  { %9 = vsyncpa [#allocation7], 0  ;;  %s929_s0 = inlined_call_operand.vmem [shape: f32[2,4,32], index: 0, kind: input, shape index: {}]   ;;  %s930_s1 = inlined_call_operand.hbm [shape: f32[2,32,256], index: 1, kind: input, shape index: {}]   ;;  %s931_s2 = inlined_call_operand.vmem [shape: u8[2,1,256], index: 2, kind: input, shape index: {}]   ;;  %s932_s3 = inlined_call_operand.vmem [shape: s32[2,4,1], index: 3, kind: input, shape index: {}]   ;;  %s933_s4 = inlined_call_operand.vmem [shape: f32[2,1,1], index: 4, kind: output, shape index: {}]  }
   0x1   :  { %11 = vsyncpa [#allocation7 + $0x1], 0  ;;  %s776_s15 = smov 0   ;;  %s778_s16 = smov 0  }
   0x2   :  { %s780_s17 = smov 0   ;;  %s782_s18 = smov 0  }
   0x3   :  { %s784_s19 = smov 0   ;;  %s786_s20 = smov 0  }
   0x4 LB: > { %s575_s21 = sadd.s32 4294967295, %s744_s20   ;;  %s29_s22 = sadd.s32 1, %s740_s19  ;;  %s744_s20 = sphi %s786_s20, %s17_s20   ;;  %s740_s19 = sphi %s784_s19, %s943_s19   ;;  %s736_s18 = sphi %s782_s18, %s942_s18   ;;  %s732_s17 = sphi %s780_s17, %s941_s17   ;;  %s728_s16 = sphi %s778_s16, %s940_s16   ;;  %s724_s15 = sphi %s776_s15, %s939_s15  }
   0x5   : > { %p31_p0 = scmp.ge.s32.totalorder %s29_s22, 2  ;;  %s64_s23 = sadd.s32 1, %s732_s17 }
   0x6   : > { %p71_p1 = scmp.ne.s32.totalorder %s732_s17, %s728_s16  ;;  %p72_p2 = scmp.eq.s32.totalorder %s744_s20, 0 }
   0x7   : > { %s945_s22 = smov (%p31_p0, %s29_s22), 0  ;;  %p77_p4 = scmp.ne.s32.totalorder %s728_s16, %s724_s15 }
   0x8   : > { %p812_p3 = por %p72_p2, %p71_p1  ;;  %s59_s25 = ssub.s32 %s740_s19, %s945_s22 }
   0x9   : > { %p78_p5 = scmp.eq.s32.totalorder %s575_s21, 0  ;;  %p62_p6 = scmp.eq.s32.totalorder %s59_s25, 0 }
   0xa   : > { %p599_p8 = scmp.lt.s32.totalorder %s744_s20, 2  ;;  %s188_s28 = sand.u32 1, %s732_s17  }
   0xb   : > { %p819_p7 = por %p78_p5, %p77_p4  ;;  %s592_s29 = sshll.u32 %s740_s19, 10 }
   0xc   : > { %s825_s27 = scalar_select %p62_p6, %s732_s17, %s64_s23  }
   0xd   : > { %s579_s30 = sshll.u32 %s188_s28, 6  ;;  %s832_s7 = scalar_lea.hbm %s930_s1, %s592_s29 }
   0xe   : > { %s192_s8 = scalar_lea.vmem [#allocation6], %s579_s30  ;;  %p836_p9 = pnand %p599_p8, %p812_p3 }
   0xf   : > { %s201_s9 = sshll.u32 %s192_s8, 4  ;;  %s842_s11 = scalar_lea.sflag [#allocation7], %s188_s28  ;;  %s840_s9 = int_to_ptr.vmem [resolvable:$true] %s201_s9 }
  0x10   : > { %s664_s12 = scalar_lea.hbm %s832_s7, 1024  ;;  %p666_p11 = pneg %p836_p9 }
  0x11   : > { %p665_p10 = scmp.ne.s32.totalorder %s832_s7, %s664_s12  ;;  %s669_s15 = scalar_lea.hbm %s930_s1, 2048 }
  0x12   : > { %p670_p0 = scmp.lt.u32.totalorder %s832_s7, %s930_s1  ;;  %p671_p1 = scmp.lt.u32.totalorder %s669_s15, %s664_s12 }
  0x13   : > { %p667_p12 = pnand %p666_p11, %p665_p10  ;;  %p673_p3 = scmp.lt.u32.totalorder %s664_s12, %s832_s7 }
  0x14   : > { %p672_p2 = por %p671_p1, %p670_p0 }
  0x15   : > { %p668_p13 = pneg %p667_p12 }
  0x16   : > { %p674_p4 = por %p673_p3, %p672_p2 }
  0x18   : > { %p675_p5 = pnand %p674_p4, %p668_p13 }
  0x1a   : > { %678 = shalt.err (!%p675_p5)
}
  0x1b   : > { %s679_s24 = scalar_lea.vmem %s840_s9, 1024  ;;  %s746_s25 = smov [#allocation6]  }
  0x1c   : > { %p680_p6 = scmp.ne.s32.totalorder %s840_s9, %s679_s24  ;;  %s684_s28 = sshll.u32 %s746_s25, 4  ;;  %s685_s28 = int_to_ptr.vmem [resolvable:$false] %s684_s28 }
  0x1d   : > { %s686_s29 = scalar_lea.vmem %s685_s28, 2048  ;;  %p687_p12 = scmp.lt.s32.totalorder %s840_s9, %s685_s28 }
  0x1e   : > { %p682_p8 = pnand %p680_p6, %p666_p11  ;;  %p688_p0 = scmp.lt.s32.totalorder %s686_s29, %s679_s24 }
  0x20   : > { %p683_p10 = pneg %p682_p8  ;;  %p689_p1 = por %p688_p0, %p687_p12 }
  0x22   : > { %p690_p2 = pnand %p689_p1, %p683_p10 }
  0x24   : > { %693 = shalt.err (!%p690_p2)
}
  0x25   : > { %s747_s30 = smov 256   ;;  %s748_s5 = smov 16  }
  0x26   : > { %598 = dma.hbm_to_vmem [thread:$0]  (!%p836_p9), %s832_s7, 1024, %s840_s9, %s842_s11, %s747_s30, %s747_s30, %s748_s5  }
  0x27   : > { %p582_p11 = scmp.ge.s32.totalorder %s744_s20, 1  ;;  %p228_p13 = scmp.lt.s32.totalorder %s744_s20, 3 }
  0x29   : > { %p229_p3 = pnand %p582_p11, %p228_p13 }
  0x2a   : > { %s234_s6 = sand.u32 (!%p229_p3), 1, %s728_s16  }
  0x2b   : > { %232 = sbr.rel (%p229_p3) target bundleno = 645 (0x285), region = 36  ;;  %s583_s8 = sshll.u32 (!%p229_p3), %s234_s6, 6 }
  0x2c   : > { %s235_s12 = scalar_lea.sflag (!%p229_p3), [#allocation7], %s234_s6  ;;  %s238_s13 = scalar_lea.vmem (!%p229_p3), [#allocation6], %s583_s8 }
  0x32   : > { %719 = dma.done.wait (%p819_p7), %s235_s12, 1024  }
  0x33   : > { %721 = vsyncadd (%p819_p7), %s235_s12, 4294966272  ;;  %p277_p4 = scmp.lt.s32.totalorder %s736_s18, 1  ;;  %vm308_vm0 = vcmask 257024   ;;  %v319_v3 = vld [vmem:[%s238_s13 + $0x8] sm:$0xff]  ;;  %v321_v4 = vld [vmem:[%s238_s13 + $0x18] sm:$0xff]  ;;  %v749_v14 = vmov 0   ;;  %v376_v23 = vlaneseq }
  0x34   : > { %v327_v5 = vpack.c.bf16 %v321_v4, %v319_v3  ;;  %v318_v6 = vld [vmem:[%s238_s13] sm:$0xff]  ;;  %v320_v7 = vld [vmem:[%s238_s13 + $0x10] sm:$0xff]  ;;  %v323_v9 = vld [vmem:[%s238_s13 + $0x28] sm:$0xff]  ;;  %367 = vmatprep.mubr.bf16.mxu0 %v749_v14  ;;  %v750_v16 = vmov 0.0   ;;  %vm316_vm1 = vcmask 254976   ;;  %vm331_vm2 = vcmask 261120  }
  0x35   : > { %s947_s18 = smov (!%p277_p4, %s736_s18), 1  ;;  %v326_v8 = vpack.c.bf16 %v320_v7, %v318_v6  ;;  %v325_v10 = vld [vmem:[%s238_s13 + $0x38] sm:$0xff]  ;;  %v322_v11 = vld [vmem:[%s238_s13 + $0x20] sm:$0xff]  ;;  %v324_v13 = vld [vmem:[%s238_s13 + $0x30] sm:$0xff]  ;;  %303 = vst [vmem:[#allocation3] sm:$0xf] %v750_v16 }
  0x36   : > { %s584_s7 = sshll.u32 %s947_s18, 2  ;;  %335 = vmatprep.subr.bf16.mxu0 %v327_v5  ;;  %v329_v12 = vpack.c.bf16 %v325_v10, %v323_v9  ;;  %v328_v15 = vpack.c.bf16 %v324_v13, %v322_v11  ;;  %304 = vst [vmem:[#allocation4] sm:$0xf] %v750_v16  ;;  %305 = vst [vmem:[#allocation5] sm:$0xf] %v750_v16  ;;  %s585_s26 = sshll.u32 %s947_s18, 1 }
  0x37   : > { %s280_s11 = scalar_lea.vmem %s929_s0, %s584_s7  ;;  %336 = vmatpush1.bf16.msra.mxu0 %v326_v8  ;;  %s289_s21 = scalar_lea.vmem %s931_s2, %s585_s26  ;;  %v377_v25 = vshrl.u32 %v376_v23, 7  ;;  %vm426_vm5 = vcmask 1043456   ;;  %vm456_vm8 = vcmask 3072   ;;  %vm464_vm9 = vcmask 0  }
  0x38   : > { %v306_v0 = vld [vmem:[%s280_s11] sm:$0xf]  ;;  %337 = vmatprep.subr.bf16.mxu0 %v329_v12  ;;  %s294_s25 = scalar_lea.vmem %s932_s3, %s584_s7  ;;  %s297_s30 = scalar_lea.vmem %s933_s4, %s947_s18 }
  0x39   : > { %v307_v1 = vmul.f32 %v306_v0, %v306_v0  ;;  %v379_v24 = vld [vmem:[%s289_s21] sm:$0x3]  ;;  %v384_v28 = vsub.s32 0, %v377_v25  ;;  %v388_v29 = vsub.s32 4, %v377_v25  ;;  %v378_v32 = vadd.s32 1, %v377_v25 }
  0x3a   : > { %v380_v26 = vunpack.c.0.s8 %v379_v24  ;;  %v450_v10 = vld [vmem:[%s294_s25] sm:$0xf] }
  0x3b   : > { %v309_v2 = vsel %vm308_vm0, %v307_v1, 0.0  ;;  %338 = vmatpush1.bf16.msra.mxu0 %v328_v15  ;;  %vm451_vm7 = vcmp.eq.s32.totalorder %v450_v10, 1 }
  0x3c   : > { %310 = vadd.xlane.f32.xlu0 %v309_v2  ;;  %v381_v27 = vand.u32 255, %v380_v26  ;;  %v400_v56 = vld [vmem:[#allocation3] sm:$0xf] }
  0x3d   : > { %v408_v39 = vld [vmem:[#allocation4] sm:$0xf]  ;;  %v416_v48 = vld [vmem:[#allocation5] sm:$0xf] }
  0x3e   : > { %v385_v30 = vrot.slane %v381_v27, %v384_v28  ;;  %v389_v31 = vrot.slane %v381_v27, %v388_v29 }
  0x40   : > { %v393_v33 = vrot.slane %v385_v30, %v384_v28  ;;  %v397_v34 = vrot.slane %v389_v31, %v384_v28 }
  0x42   : > { %vm398_vm3 = vcmp.eq.s32.totalorder %v393_v33, %v378_v32  ;;  %vm891_vm4 = vcmp.eq.s32.totalorder %v397_v34, %v378_v32 }
  0x43   : > { %v588_v36 = vsel %vm398_vm3, 1.0, %v750_v16  ;;  %v589_v37 = vsel %vm891_vm4, 1.0, %v750_v16 }
  0x44   : > { %v413_v38 = vadd.f32 %v589_v37, %v588_v36 }
  0x46   : > { %v414_v40 = vadd.f32 %v413_v38, %v408_v39 }
  0x48   : > { %415 = vst [vmem:[#allocation4] sm:$0xf] %v414_v40 }
  0x4f   : > { %v430_v41 = vld [vmem:[#allocation4] sm:$0xf] }
  0x50   : > { %v431_v42 = vsel %vm426_vm5, %v430_v41, 0.0 }
  0x51   : > { %432 = vadd.xlane.f32.xlu1 %v431_v42 }
  0xc9   : > { %v311_v17 = vpop.xlane.xlu0 %310 }
  0xca   : > { %v312_v18 = vmax.f32 %v311_v17, 1e-16 }
  0xcc   : > { %652 = vrsqrt.f32 %v312_v18 }
  0xd6   : > { %v653_v19 = vpop.eup %652 }
  0xd7   : > { %v314_v20 = vmul.f32 %v653_v19, %v306_v0 }
  0xd9   : > { %v315_v21 = vpack.c.bf16 %v314_v20, %v314_v20 }
  0xdb   : > { %317 = vst.msk [vmem:[#allocation2] sm:$0x3] %vm316_vm1, %v315_v21 }
  0xde   : > { %v433_v2 = vpop.xlane.xlu1 %432 }
  0xdf   : > { %v452_v4 = vadd.f32 0.0001, %v433_v2 }
  0xe2   : > { %v330_v22 = vld [vmem:[#allocation2] sm:$0x3] }
  0xe3   : > { %587 = vmatmul.mubr.msk.bf16.vlgmr.msra.gmra.mrb[0].mxu0 %vm331_vm2, %v330_v22 }
 0x1b6   : > { %v369_v43 = vpop.f32.mrb[0].mxu0 }
 0x1b7   : > { %v401_v44 = vmul.f32 1.442695, %v369_v43  ;;  %v417_v45 = vsel %vm398_vm3, %v369_v43, 0.0  ;;  %v371_v46 = vpop.f32.mrb[1].mxu0 }
 0x1b8   : > { %v403_v47 = vmul.f32 1.442695, %v371_v46  ;;  %v418_v49 = vsel %vm891_vm4, %v371_v46, 0.0  ;;  %v373_v50 = vpop.f32.mrb[2].mxu0 }
 0x1b9   : > { %654 = vpow2.f32 %v401_v44  ;;  %v419_v51 = vadd.f32 %v418_v49, %v417_v45  ;;  %v374_v52 = vpop.f32.mrb[3].mxu0 }
 0x1ba   : > { %656 = vpow2.f32 %v403_v47 }
 0x1bb   : > { %v420_v53 = vadd.f32 %v419_v51, %v416_v48 }
 0x1bd   : > { %421 = vst [vmem:[#allocation5] sm:$0xf] %v420_v53 }
 0x1c3   : > { %v655_v54 = vpop.eup %654 }
 0x1c4   : > { %v657_v55 = vpop.eup %656  ;;  %v434_v57 = vld [vmem:[#allocation5] sm:$0xf] }
 0x1c5   : > { %v405_v58 = vadd.f32 %v657_v55, %v655_v54  ;;  %v435_v59 = vsel %vm426_vm5, %v434_v57, 0.0 }
 0x1c6   : > { %436 = vadd.xlane.f32.xlu1 %v435_v59 }
 0x1c7   : > { %v406_v60 = vadd.f32 %v405_v58, %v400_v56 }
 0x1c9   : > { %407 = vst [vmem:[#allocation3] sm:$0xf] %v406_v60 }
 0x1d0   : > { %v425_v61 = vld [vmem:[#allocation3] sm:$0xf] }
 0x1d1   : > { %v427_v62 = vsel %vm426_vm5, %v425_v61, 0.0 }
 0x1d2   : > { %428 = vadd.xlane.f32.xlu0 %v427_v62 }
 0x253   : > { %v437_v11 = vpop.xlane.xlu1 %436 }
 0x25f   : > { %v429_v63 = vpop.xlane.xlu0 %428 }
 0x260   : > { %v439_v0 = vadd.f32 0.0001, %v429_v63  ;;  %v444_v1 = vadd.f32 1.0, %v429_v63  ;;  %vm438_vm6 = vcmp.ne.f32.partialorder %v429_v63, 0.0 }
 0x262   : > { %658 = vlog2.f32 %v439_v0  ;;  %v445_v3 = vadd.f32 0.0001, %v444_v1 }
 0x264   : > { %660 = vlog2.f32 %v445_v3 }
 0x265   : > { %662 = vrcp.f32 %v452_v4 }
 0x26c   : > { %v659_v5 = vpop.eup %658 }
 0x26d   : > { %v441_v6 = vmul.f32 0.6931472, %v659_v5 }
 0x26e   : > { %v661_v7 = vpop.eup %660 }
 0x26f   : > { %v442_v8 = vmul.f32 %v441_v6, %v433_v2  ;;  %v447_v9 = vmul.f32 0.6931472, %v661_v7  ;;  %v663_v12 = vpop.eup %662 }
 0x271   : > { %v443_v13 = vsub.f32 %v442_v8, %v437_v11  ;;  %v448_v14 = vmul.f32 %v447_v9, %v433_v2 }
 0x273   : > { %v449_v15 = vsel %vm438_vm6, %v443_v13, %v448_v14 }
 0x274   : > { %v454_v16 = vmul.f32 %v663_v12, %v449_v15 }
 0x276   : > { %v455_v17 = vsel %vm451_vm7, %v454_v16, 0.0 }
 0x277   : > { %v457_v18 = vsel %vm456_vm8, %v455_v17, 0.0 }
 0x278   : > { %v458_v19 = vrot.slane %v457_v18, 4 }
 0x27a   : > { %v459_v20 = vadd.f32 %v458_v19, %v457_v18 }
 0x27c   : > { %v460_v21 = vrot.slane %v459_v20, 2 }
 0x27e   : > { %v461_v22 = vadd.f32 %v460_v21, %v459_v20 }
 0x280   : > { %v462_v23 = vrot.slane %v461_v22, 1 }
 0x282   : > { %v463_v24 = vadd.f32 %v462_v23, %v461_v22 }
 0x284   : > { %465 = vst.msk [vmem:[%s297_s30] sm:$0x1] %vm464_vm9, %v463_v24 }
 0x285 PF: > { %s17_s20 = sadd.s32 1, %s744_s20   ;;  %s939_s15 = smov %s728_s16 }
 0x286   : > { %p14_p7 = scmp.ge.s32.totalorder %s17_s20, 4   ;;  %s940_s16 = smov %s732_s17 }
 0x287   : > { %s941_s17 = smov %s825_s27  ;;  %s942_s18 = smov %s740_s19 }
 0x288   : > { %s943_s19 = smov %s945_s22  ;;  %16 = sbr.rel (!%p14_p7) target bundleno = 4 (0x4), region = 93 }
 0x28f   :  { %483 = vsyncpa [#allocation7], 1 }
 0x290   :  { %485 = vsyncpa [#allocation7 + $0x1], 1 }

</bundles_post_ra>
